<compile_context>
chip_gen: v7x
topology: tpu7x:2x2x1
jax: 0.10.0
libtpu: 0.0.40
codegen_flags: <defaults>
</compile_context>

<pallas_src>
import jax
import jax.numpy as jnp
from jax.experimental import pallas as pl
from jax.experimental.pallas import tpu as pltpu


def _se_kernel(x_ref, w1_ref, b1_ref, w2_ref, b2_ref, o_ref):
    """Fused SE block for a slab of Bn samples resident in VMEM.

    x_ref / o_ref : (Bn, C, HW)   input dtype, HW on lanes, C on sublanes
    w1_ref        : (Cr_p, C)     fc1 weight (1x1 conv), Cr zero-padded
    b1_ref        : (Cr_p, 1)
    w2_ref        : (C, Cr_p)     fc2 weight (1x1 conv), Cr zero-padded
    b2_ref        : (C, 1)
    """
    bn = x_ref.shape[0]
    hw = x_ref.shape[-1]
    inv_hw = 1.0 / hw

    # Static unroll over the samples of this block (Bn is small); each
    # iteration's tiny FC chain overlaps with neighbouring iterations' big
    # rescale multiplies under the LLO scheduler.
    for b in range(bn):
        xb = x_ref[b]                                              # (C, HW), native dtype

        # Global average pool over spatial (lane-axis reduction), f32 accumulate.
        pooled = jnp.sum(xb.astype(jnp.float32), axis=-1, keepdims=True) * inv_hw   # (C, 1)

        # fc1 (1x1 conv == matmul) + relu:  (Cr_p, C) @ (C, 1) -> (Cr_p, 1)
        h = jnp.dot(w1_ref[...], pooled, preferred_element_type=jnp.float32) + b1_ref[...]
        h = jnp.maximum(h, 0.0)

        # fc2 + sigmoid:  (C, Cr_p) @ (Cr_p, 1) -> (C, 1)
        s = jnp.dot(w2_ref[...], h, preferred_element_type=jnp.float32) + b2_ref[...]
        s = jax.nn.sigmoid(s)

        # Channel-wise rescale in the INPUT dtype (broadcast along lanes);
        # no f32 copy of the block, no extra temp for the store.
        o_ref[b] = xb * s.astype(o_ref.dtype)


def _pick_block_batch(n, per_sample_bytes, target_bytes=2 << 20,
                      min_bytes=512 << 10, max_bn=32):
    """Samples per grid step: blocks ~0.5-2 MiB, prefer >=2 grid steps, Bn | N."""
    bn = max(1, min(n, max_bn, target_bytes // max(per_sample_bytes, 1)))
    while n % bn:
        bn -= 1
    # Prefer at least 2 grid steps (v7x megacore + double-buffer overlap) as
    # long as the block does not drop below ~512 KiB.
    while n // bn < 2 and bn > 1 and (bn // 2) * per_sample_bytes >= min_bytes:
        bn //= 2
        while n % bn:
            bn -= 1
    return bn


def se_module(x_nchw, w1, b1, w2, b2):
    """SEModule forward. w1:(C_red,C) b1:(C_red,) w2:(C,C_red) b2:(C,)."""
    N, C, H, W = x_nchw.shape
    HW = H * W
    C_red = w1.shape[0]
    dtype = x_nchw.dtype
    f32 = jnp.float32

    # Pad the reduced dim to a multiple of 8 sublanes; the zero padding is
    # mathematically inert (b1 pad = 0, relu(0) = 0, zero W2 columns add 0).
    Cr_p = max(8, ((C_red + 7) // 8) * 8)
    w1_p = jnp.zeros((Cr_p, C), f32).at[:C_red, :].set(jnp.asarray(w1, f32))
    b1_p = jnp.zeros((Cr_p, 1), f32).at[:C_red, 0].set(jnp.asarray(b1, f32))
    w2_p = jnp.zeros((C, Cr_p), f32).at[:, :C_red].set(jnp.asarray(w2, f32))
    b2_c = jnp.asarray(b2, f32).reshape(C, 1)

    # Free reshape NCHW -> (N, C, H*W): no transpose, no extra HBM traffic.
    # (HW = 256 here is a multiple of 128 -> lane-dense, unmasked stores. For
    #  HW like 49/196 the block still equals the full dim and is legal; one
    #  would pad HW to 128 lanes only if masked stores showed up as the
    #  bottleneck.)
    x3 = x_nchw.reshape(N, C, HW)

    # Batch samples per grid step so each x/out block is ~0.5-2 MiB.
    per_sample_bytes = C * HW * x3.dtype.itemsize
    Bn = _pick_block_batch(N, per_sample_bytes)
    grid = (N // Bn,)

    # VMEM budget: double-buffered in + out blocks + (double-buffered) params.
    block_bytes = Bn * per_sample_bytes
    param_bytes = 4 * (w1_p.size + b1_p.size + w2_p.size + b2_c.size)
    needed = 4 * block_bytes + 2 * param_bytes + (2 << 20)
    ck = dict(dimension_semantics=("parallel",))            # batch is independent
    if needed > (16 << 20):                                  # above v5e scoped default
        ck["vmem_limit_bytes"] = int(min(needed, 48 << 20))  # stay inside v7x's 64 MiB
    # If a single (C, HW) sample ever exceeds this budget, a two-pass
    # (pool sweep + scale sweep) fallback over HW tiles would be required.

    out = pl.pallas_call(
        _se_kernel,
        out_shape=jax.ShapeDtypeStruct((N, C, HW), dtype),
        grid_spec=pltpu.PrefetchScalarGridSpec(
            num_scalar_prefetch=0,
            grid=grid,
            in_specs=[
                pl.BlockSpec((Bn, C, HW), lambda n: (n, 0, 0)),   # Bn samples per step
                pl.BlockSpec((Cr_p, C), lambda n: (0, 0)),        # fc1 weight (constant)
                pl.BlockSpec((Cr_p, 1), lambda n: (0, 0)),        # fc1 bias
                pl.BlockSpec((C, Cr_p), lambda n: (0, 0)),        # fc2 weight
                pl.BlockSpec((C, 1), lambda n: (0, 0)),           # fc2 bias
            ],
            out_specs=pl.BlockSpec((Bn, C, HW), lambda n: (n, 0, 0)),
        ),
        compiler_params=pltpu.CompilerParams(**ck),
    )(x3, w1_p, b1_p, w2_p, b2_c)

    return out.reshape(N, C, H, W)


def _reference(x_nchw, w1, b1, w2, b2):
    """Pure-JAX reference for the SEModule forward pass."""
    xf = x_nchw.astype(jnp.float32)
    pooled = jnp.mean(xf, axis=(2, 3))                       # (N, C)
    h = jnp.maximum(pooled @ w1.T + b1, 0.0)                 # (N, C_red)
    s = jax.nn.sigmoid(h @ w2.T + b2)                        # (N, C)
    return xf * s[:, :, None, None]


if __name__ == "__main__":
    key = jax.random.PRNGKey(0)
    kx, k1, k2, k3, k4 = jax.random.split(key, 5)

    # Small shapes consistent with the module: reduction=16 needs C >= 16.
    N, C, H, W = 2, 32, 16, 16
    reduction = 16
    C_red = C // reduction   # = 2

    x = jax.random.normal(kx, (N, C, H, W), dtype=jnp.float32)
    w1 = 0.1 * jax.random.normal(k1, (C_red, C), dtype=jnp.float32)   # fc1 (1x1 conv)
    b1 = 0.1 * jax.random.normal(k2, (C_red,), dtype=jnp.float32)
    w2 = 0.1 * jax.random.normal(k3, (C, C_red), dtype=jnp.float32)   # fc2 (1x1 conv)
    b2 = 0.1 * jax.random.normal(k4, (C,), dtype=jnp.float32)

    out = jax.block_until_ready(se_module(x, w1, b1, w2, b2))
    ref = _reference(x, w1, b1, w2, b2)

    assert out.shape == (N, C, H, W)
    assert jnp.allclose(out, ref, atol=1e-4, rtol=1e-4)

    print("KERNEL_OK")
</pallas_src>

<mosaic_0001>
module attributes {stable_mosaic.version = 11 : i64} {
  func.func @_se_kernel(%arg0: i32, %arg1: memref<2x32x256xf32, #tpu.memory_space<vmem>>, %arg2: memref<8x32xf32, #tpu.memory_space<vmem>>, %arg3: memref<8x1xf32, #tpu.memory_space<vmem>>, %arg4: memref<32x8xf32, #tpu.memory_space<vmem>>, %arg5: memref<32x1xf32, #tpu.memory_space<vmem>>, %arg6: memref<2x32x256xf32, #tpu.memory_space<vmem>>) attributes {dimension_semantics = [#tpu.dimension_semantics<parallel>], iteration_bounds = array<i64: 1>, scalar_prefetch = 0 : i64, scratch_operands = 0 : i64, tpu.core_type = #tpu.core_type<tc>, window_params = [{transform_indices = @transform_0, window_bounds = array<i64: 2, 32, 256>}, {pipeline_mode = #tpu.pipeline_mode<synchronous>, transform_indices = @transform_1, window_bounds = array<i64: 8, 32>}, {pipeline_mode = #tpu.pipeline_mode<synchronous>, transform_indices = @transform_2, window_bounds = array<i64: 8, 1>}, {pipeline_mode = #tpu.pipeline_mode<synchronous>, transform_indices = @transform_3, window_bounds = array<i64: 32, 8>}, {pipeline_mode = #tpu.pipeline_mode<synchronous>, transform_indices = @transform_4, window_bounds = array<i64: 32, 1>}, {transform_indices = @transform_5, window_bounds = array<i64: 2, 32, 256>}]} {
    %c0 = arith.constant 0 : index
    %c0_0 = arith.constant 0 : index
    %c0_1 = arith.constant 0 : index
    %0 = vector.load %arg1[%c0, %c0_0, %c0_1] : memref<2x32x256xf32, #tpu.memory_space<vmem>>, vector<1x32x256xf32>
    %1 = vector.shape_cast %0 : vector<1x32x256xf32> to vector<32x256xf32>
    %cst = arith.constant dense<0.000000e+00> : vector<32xf32>
    %2 = vector.multi_reduction <add>, %1, %cst [1] : vector<32x256xf32> to vector<32xf32>
    %3 = vector.shape_cast %2 : vector<32xf32> to vector<32x1xf32>
    %cst_2 = arith.constant 3.906250e-03 : f32
    %4 = vector.broadcast %cst_2 : f32 to vector<32x1xf32>
    %5 = arith.mulf %3, %4 : vector<32x1xf32>
    %c0_3 = arith.constant 0 : index
    %c0_4 = arith.constant 0 : index
    %6 = vector.load %arg2[%c0_3, %c0_4] : memref<8x32xf32, #tpu.memory_space<vmem>>, vector<8x32xf32>
    %cst_5 = arith.constant dense<0.000000e+00> : vector<8x1xf32>
    %7 = tpu.matmul %6, %5, %cst_5 {dimension_numbers = #tpu.dot_dimension_numbers<[1], [0], [0], [1], [0, 0, 1, 1], [], []>} : vector<8x32xf32>, vector<32x1xf32>, vector<8x1xf32> -> vector<8x1xf32>
    %c0_6 = arith.constant 0 : index
    %c0_7 = arith.constant 0 : index
    %8 = vector.load %arg3[%c0_6, %c0_7] : memref<8x1xf32, #tpu.memory_space<vmem>>, vector<8x1xf32>
    %9 = arith.addf %7, %8 : vector<8x1xf32>
    %cst_8 = arith.constant 0.000000e+00 : f32
    %10 = vector.broadcast %cst_8 : f32 to vector<8x1xf32>
    %11 = arith.maximumf %9, %10 : vector<8x1xf32>
    %c0_9 = arith.constant 0 : index
    %c0_10 = arith.constant 0 : index
    %12 = vector.load %arg4[%c0_9, %c0_10] : memref<32x8xf32, #tpu.memory_space<vmem>>, vector<32x8xf32>
    %cst_11 = arith.constant dense<0.000000e+00> : vector<32x1xf32>
    %13 = tpu.matmul %12, %11, %cst_11 {dimension_numbers = #tpu.dot_dimension_numbers<[1], [0], [0], [1], [0, 0, 1, 1], [], []>} : vector<32x8xf32>, vector<8x1xf32>, vector<32x1xf32> -> vector<32x1xf32>
    %c0_12 = arith.constant 0 : index
    %c0_13 = arith.constant 0 : index
    %14 = vector.load %arg5[%c0_12, %c0_13] : memref<32x1xf32, #tpu.memory_space<vmem>>, vector<32x1xf32>
    %15 = arith.addf %13, %14 : vector<32x1xf32>
    %16 = arith.negf %15 : vector<32x1xf32>
    %17 = math.exp %16 : vector<32x1xf32>
    %cst_14 = arith.constant 1.000000e+00 : f32
    %18 = vector.broadcast %cst_14 : f32 to vector<32x1xf32>
    %19 = arith.addf %18, %17 : vector<32x1xf32>
    %20 = arith.divf %18, %19 : vector<32x1xf32>
    %21 = vector.broadcast %20 : vector<32x1xf32> to vector<32x256xf32>
    %22 = arith.mulf %1, %21 : vector<32x256xf32>
    %c0_15 = arith.constant 0 : index
    %c0_16 = arith.constant 0 : index
    %c0_17 = arith.constant 0 : index
    %23 = vector.load %arg6[%c0_15, %c0_16, %c0_17] : memref<2x32x256xf32, #tpu.memory_space<vmem>>, vector<1x32x256xf32>
    %24 = vector.shape_cast %23 : vector<1x32x256xf32> to vector<32x256xf32>
    %25 = vector.shape_cast %22 : vector<32x256xf32> to vector<1x32x256xf32>
    tpu.vector_store %arg6[%c0_15, %c0_16, %c0_17], %25 {strides = array<i32>} : memref<2x32x256xf32, #tpu.memory_space<vmem>>, vector<1x32x256xf32>,
    %c1 = arith.constant 1 : index
    %c0_18 = arith.constant 0 : index
    %c0_19 = arith.constant 0 : index
    %26 = vector.load %arg1[%c1, %c0_18, %c0_19] : memref<2x32x256xf32, #tpu.memory_space<vmem>>, vector<1x32x256xf32>
    %27 = vector.shape_cast %26 : vector<1x32x256xf32> to vector<32x256xf32>
    %cst_20 = arith.constant dense<0.000000e+00> : vector<32xf32>
    %28 = vector.multi_reduction <add>, %27, %cst_20 [1] : vector<32x256xf32> to vector<32xf32>
    %29 = vector.shape_cast %28 : vector<32xf32> to vector<32x1xf32>
    %cst_21 = arith.constant 3.906250e-03 : f32
    %30 = vector.broadcast %cst_21 : f32 to vector<32x1xf32>
    %31 = arith.mulf %29, %30 : vector<32x1xf32>
    %c0_22 = arith.constant 0 : index
    %c0_23 = arith.constant 0 : index
    %32 = vector.load %arg2[%c0_22, %c0_23] : memref<8x32xf32, #tpu.memory_space<vmem>>, vector<8x32xf32>
    %cst_24 = arith.constant dense<0.000000e+00> : vector<8x1xf32>
    %33 = tpu.matmul %32, %31, %cst_24 {dimension_numbers = #tpu.dot_dimension_numbers<[1], [0], [0], [1], [0, 0, 1, 1], [], []>} : vector<8x32xf32>, vector<32x1xf32>, vector<8x1xf32> -> vector<8x1xf32>
    %c0_25 = arith.constant 0 : index
    %c0_26 = arith.constant 0 : index
    %34 = vector.load %arg3[%c0_25, %c0_26] : memref<8x1xf32, #tpu.memory_space<vmem>>, vector<8x1xf32>
    %35 = arith.addf %33, %34 : vector<8x1xf32>
    %cst_27 = arith.constant 0.000000e+00 : f32
    %36 = vector.broadcast %cst_27 : f32 to vector<8x1xf32>
    %37 = arith.maximumf %35, %36 : vector<8x1xf32>
    %c0_28 = arith.constant 0 : index
    %c0_29 = arith.constant 0 : index
    %38 = vector.load %arg4[%c0_28, %c0_29] : memref<32x8xf32, #tpu.memory_space<vmem>>, vector<32x8xf32>
    %cst_30 = arith.constant dense<0.000000e+00> : vector<32x1xf32>
    %39 = tpu.matmul %38, %37, %cst_30 {dimension_numbers = #tpu.dot_dimension_numbers<[1], [0], [0], [1], [0, 0, 1, 1], [], []>} : vector<32x8xf32>, vector<8x1xf32>, vector<32x1xf32> -> vector<32x1xf32>
    %c0_31 = arith.constant 0 : index
    %c0_32 = arith.constant 0 : index
    %40 = vector.load %arg5[%c0_31, %c0_32] : memref<32x1xf32, #tpu.memory_space<vmem>>, vector<32x1xf32>
    %41 = arith.addf %39, %40 : vector<32x1xf32>
    %42 = arith.negf %41 : vector<32x1xf32>
    %43 = math.exp %42 : vector<32x1xf32>
    %cst_33 = arith.constant 1.000000e+00 : f32
    %44 = vector.broadcast %cst_33 : f32 to vector<32x1xf32>
    %45 = arith.addf %44, %43 : vector<32x1xf32>
    %46 = arith.divf %44, %45 : vector<32x1xf32>
    %47 = vector.broadcast %46 : vector<32x1xf32> to vector<32x256xf32>
    %48 = arith.mulf %27, %47 : vector<32x256xf32>
    %c1_34 = arith.constant 1 : index
    %c0_35 = arith.constant 0 : index
    %c0_36 = arith.constant 0 : index
    %49 = vector.load %arg6[%c1_34, %c0_35, %c0_36] : memref<2x32x256xf32, #tpu.memory_space<vmem>>, vector<1x32x256xf32>
    %50 = vector.shape_cast %49 : vector<1x32x256xf32> to vector<32x256xf32>
    %51 = vector.shape_cast %48 : vector<32x256xf32> to vector<1x32x256xf32>
    tpu.vector_store %arg6[%c1_34, %c0_35, %c0_36], %51 {strides = array<i32>} : memref<2x32x256xf32, #tpu.memory_space<vmem>>, vector<1x32x256xf32>,
    return
  }
  func.func @transform_0(%arg0: i32) -> (i32, i32, i32) {
    %c0_i32 = arith.constant 0 : i32
    %c0_i32_0 = arith.constant 0 : i32
    %c0_i32_1 = arith.constant 0 : i32
    return %arg0, %c0_i32, %c0_i32_0 : i32, i32, i32
  }
  func.func @transform_1(%arg0: i32) -> (i32, i32) {
    %c0_i32 = arith.constant 0 : i32
    %c0_i32_0 = arith.constant 0 : i32
    %c0_i32_1 = arith.constant 0 : i32
    return %c0_i32, %c0_i32_0 : i32, i32
  }
  func.func @transform_2(%arg0: i32) -> (i32, i32) {
    %c0_i32 = arith.constant 0 : i32
    %c0_i32_0 = arith.constant 0 : i32
    %c0_i32_1 = arith.constant 0 : i32
    return %c0_i32, %c0_i32_0 : i32, i32
  }
  func.func @transform_3(%arg0: i32) -> (i32, i32) {
    %c0_i32 = arith.constant 0 : i32
    %c0_i32_0 = arith.constant 0 : i32
    %c0_i32_1 = arith.constant 0 : i32
    return %c0_i32, %c0_i32_0 : i32, i32
  }
  func.func @transform_4(%arg0: i32) -> (i32, i32) {
    %c0_i32 = arith.constant 0 : i32
    %c0_i32_0 = arith.constant 0 : i32
    %c0_i32_1 = arith.constant 0 : i32
    return %c0_i32, %c0_i32_0 : i32, i32
  }
  func.func @transform_5(%arg0: i32) -> (i32, i32, i32) {
    %c0_i32 = arith.constant 0 : i32
    %c0_i32_0 = arith.constant 0 : i32
    %c0_i32_1 = arith.constant 0 : i32
    return %arg0, %c0_i32, %c0_i32_0 : i32, i32, i32
  }
}

</mosaic_0001>

<bundles_post_ra>
// kernel: tpu_custom_call.1
= control target key start
LH: loop header
LB: loop body
LE: loop exit
PB: predicated region body
PF: predicated region fallthrough
CT: control target
= control target key end

     0   :  { %10 = vsyncpa [#allocation3], 0  ;;  %s962_s0 = inlined_call_operand.hbm [shape: f32[2,32,256], index: 0, kind: input, shape index: {}]   ;;  %s963_s1 = inlined_call_operand.vmem [shape: f32[8,32], index: 1, kind: input, shape index: {}]   ;;  %s964_s2 = inlined_call_operand.vmem [shape: f32[8,1], index: 2, kind: input, shape index: {}]   ;;  %s965_s3 = inlined_call_operand.vmem [shape: f32[32,8], index: 3, kind: input, shape index: {}]   ;;  %s966_s4 = inlined_call_operand.vmem [shape: f32[32,1], index: 4, kind: input, shape index: {}]   ;;  %s967_s5 = inlined_call_operand.hbm [shape: f32[2,32,256], index: 5, kind: output, shape index: {}]  }
   0x1   :  { %11 = vsyncpa [#allocation4], 0  ;;  %s766_s18 = smov [#allocation2]   ;;  %s718_s22 = scalar_lea.hbm %s962_s0, 2048 }
   0x2   :  { %s17_s19 = sshll.u32 %s766_s18, 4  ;;  %p719_p0 = scmp.ne.s32.totalorder %s962_s0, %s718_s22  ;;  %s18_s19 = int_to_ptr.vmem [resolvable:$true] %s17_s19 }
   0x3   :  { %p722_p1 = scmp.lt.u32.totalorder %s718_s22, %s962_s0 }
   0x5   :  { %p724_p2 = pnand %p722_p1, %p719_p0 }
   0x7   :  { %727 = shalt.err (!%p724_p2)
}
   0x8   :  { %s728_s27 = scalar_lea.vmem %s18_s19, 2048  ;;  %p733_p4 = scmp.lt.s32.totalorder %s18_s19, %s18_s19 }
   0x9   :  { %p729_p3 = scmp.ne.s32.totalorder %s18_s19, %s728_s27  ;;  %p734_p5 = scmp.lt.s32.totalorder %s728_s27, %s728_s27 }
   0xb   :  { %p735_p6 = por %p734_p5, %p733_p4 }
   0xd   :  { %p736_p7 = pnand %p735_p6, %p729_p3 }
   0xf   :  { %739 = shalt.err (!%p736_p7)
}
  0x10   :  { %s767_s28 = smov 256   ;;  %s768_s29 = smov 16  }
  0x11   :  { %23 = dma.hbm_to_vmem [thread:$0]  %s962_s0, 2048, %s18_s19, [#allocation3], %s767_s28, %s767_s28, %s768_s29  }
  0x12   :  { %762 = dma.done.wait [#allocation3], 2048  }
  0x13   :  { %763 = vsyncadd [#allocation3], 4294965248  ;;  %v819_v0 = vld [vmem:[#allocation2 + $0x20] sm:$0xff]  ;;  %v821_v1 = vld [vmem:[#allocation2 + $0x28] sm:$0xff]  ;;  %v769_v12 = vmov 0.0|0.0   ;;  %vm770_vm0 = vmmov 0  }
  0x14   :  { %v823_v2 = vld [vmem:[#allocation2] sm:$0xff]  ;;  %v49_v3 = vadd.f32 %v821_v1, %v819_v0  ;;  %v827_v4 = vld [vmem:[#allocation2 + $0x8] sm:$0xff]  ;;  %v829_v5 = vld [vmem:[#allocation2 + $0x30] sm:$0xff]  ;;  %662 = vmatprep.subr.bf16.mxu0 %v769_v12  ;;  %v771_v13 = vmov 0.0   ;;  %vm61_vm1 = vcmask 261120   ;;  %vm144_vm2 = vcmask 64512  }
  0x15   :  { %v831_v6 = vld [vmem:[#allocation2 + $0x38] sm:$0xff]  ;;  %v43_v7 = vadd.f32 %v827_v4, %v823_v2  ;;  %v835_v8 = vld [vmem:[#allocation2 + $0x10] sm:$0xff]  ;;  %632 = vmatprep.mubr.msk.f32.mxu0 %vm770_vm0, %v771_v13  ;;  %v850_v16 = vld [vmem:[#allocation2 + $0x40] sm:$0xff]  ;;  %v772_v56 = vmov 0  }
  0x16   :  { %v837_v9 = vld [vmem:[#allocation2 + $0x18] sm:$0xff]  ;;  %50 = vadd.xlane.f32.xlu1 %v49_v3  ;;  %v52_v10 = vadd.f32 %v831_v6, %v829_v5  ;;  %v846_v14 = vld [vmem:[#allocation2 + $0x50] sm:$0xff]  ;;  %v854_v18 = vld [vmem:[#allocation2 + $0x48] sm:$0xff]  ;;  %684 = vset.pattern.permute.xlu0 %v772_v56 }
  0x17   :  { %44 = vadd.xlane.f32.xlu0 %v43_v7  ;;  %v46_v11 = vadd.f32 %v837_v9, %v835_v8  ;;  %v848_v15 = vld [vmem:[#allocation2 + $0x58] sm:$0xff]  ;;  %v856_v19 = vld [vmem:[#allocation2 + $0x70] sm:$0xff]  ;;  %v311_v21 = vadd.f32 %v854_v18, %v850_v16  ;;  %v862_v22 = vld [vmem:[#allocation2 + $0x60] sm:$0xff]  ;;  %685 = vset.pattern.permute.xlu1 %v772_v56 }
  0x18   :  { %v314_v17 = vadd.f32 %v848_v15, %v846_v14  ;;  %v858_v20 = vld [vmem:[#allocation2 + $0x78] sm:$0xff]  ;;  %v864_v23 = vld [vmem:[#allocation2 + $0x68] sm:$0xff]  ;;  %v59_v36 = vld [vmem:[%s963_s1] sm:$0xff] }
  0x19   :  { %v320_v24 = vadd.f32 %v858_v20, %v856_v19  ;;  %v317_v25 = vadd.f32 %v864_v23, %v862_v22  ;;  %v136_v37 = vld [vmem:[%s965_s3] sm:$0xff]  ;;  %v137_v51 = vld [vmem:[%s965_s3 + $0x8] sm:$0xff]  ;;  %v138_v53 = vld [vmem:[%s965_s3 + $0x10] sm:$0xff] }
  0x1a   :  { %53 = vadd.xlane.f32.xlu1 %v52_v10  ;;  %637 = vmatprep.mubr.msk.f32.mxu1 %vm144_vm2, %v136_v37  ;;  %v60_v40 = vld [vmem:[%s964_s2] sm:$0xff]  ;;  %v139_v55 = vld [vmem:[%s965_s3 + $0x18] sm:$0xff]  ;;  %v904_v57 = vld [vmem:[%s966_s4 + $0x8] sm:$0xff] }
  0x1b   :  { %47 = vadd.xlane.f32.xlu0 %v46_v11  ;;  %v909_v58 = vld [vmem:[%s966_s4] sm:$0xff]  ;;  %v916_v63 = vld [vmem:[%s966_s4 + $0x18] sm:$0xff]  ;;  %v921_v7 = vld [vmem:[%s966_s4 + $0x10] sm:$0xff]  ;;  %s773_s4 = smov [#allocation5]  }
  0x1c   :  { %s574_s23 = sshll.u32 %s773_s4, 4  ;;  %s575_s23 = int_to_ptr.vmem [resolvable:$true] %s574_s23 }
  0x1d   :  { %s740_s24 = scalar_lea.vmem %s575_s23, 2048  ;;  %p745_p9 = scmp.lt.s32.totalorder %s575_s23, %s575_s23 }
  0x1e   :  { %315 = vadd.xlane.f32.xlu1 %v314_v17  ;;  %p741_p8 = scmp.ne.s32.totalorder %s575_s23, %s740_s24  ;;  %p746_p10 = scmp.lt.s32.totalorder %s740_s24, %s740_s24 }
  0x1f   :  { %312 = vadd.xlane.f32.xlu0 %v311_v21 }
  0x20   :  { %p747_p11 = por %p746_p10, %p745_p9 }
  0x22   :  { %321 = vadd.xlane.f32.xlu1 %v320_v24  ;;  %p748_p12 = pnand %p747_p11, %p741_p8 }
  0x23   :  { %318 = vadd.xlane.f32.xlu0 %v317_v25 }
  0xa3   :  { %v51_v26 = vpop.xlane.xlu1 %50 }
  0xa4   :  { %v45_v27 = vpop.xlane.xlu0 %44  ;;  %v57_v32 = vmul.f32 0.00390625, %v51_v26 }
  0xa5   :  { %v55_v30 = vmul.f32 0.00390625, %v45_v27 }
  0xa7   :  { %v54_v28 = vpop.xlane.xlu1 %53 }
  0xa8   :  { %v48_v29 = vpop.xlane.xlu0 %47  ;;  %v58_v33 = vmul.f32 0.00390625, %v54_v28 }
  0xa9   :  { %v56_v31 = vmul.f32 0.00390625, %v48_v29 }
  0xaa   :  { %v666_v35 = vpack.c.bf16 %v58_v33, %v57_v32 }
  0xab   :  { %v663_v34 = vpack.c.bf16 %v56_v31, %v55_v30  ;;  %v316_v38 = vpop.xlane.xlu1 %315 }
  0xac   :  { %v313_v39 = vpop.xlane.xlu0 %312  ;;  %v324_v42 = vmul.f32 0.00390625, %v316_v38 }
  0xad   :  { %664 = vmatpush3.bf16.msra.mxu0 %v663_v34  ;;  %v323_v43 = vmul.f32 0.00390625, %v313_v39 }
  0xae   :  { %665 = vmatprep.subr.bf16.mxu0 %v769_v12 }
  0xaf   :  { %v322_v44 = vpop.xlane.xlu1 %321  ;;  %v669_v49 = vpack.c.bf16 %v324_v42, %v323_v43 }
  0xb0   :  { %v319_v47 = vpop.xlane.xlu0 %318  ;;  %v326_v50 = vmul.f32 0.00390625, %v322_v44 }
  0xb1   :  { %667 = vmatpush3.bf16.msra.mxu0 %v666_v35  ;;  %v325_v52 = vmul.f32 0.00390625, %v319_v47 }
  0xb3   :  { %v672_v54 = vpack.c.bf16 %v326_v50, %v325_v52 }
  0xb4   :  { %633 = vmatmul.mubr.msk.f32.vlgmr.msra.gmra.mrb[0].mxu0 %vm61_vm1, %v59_v36 }
  0xb5   :  { %656 = vmatprep.mubr.msk.f32.mxu0 %vm144_vm2, %v136_v37 }
 0x187   :  { %v131_v41 = vpop.f32.mrb[0].mxu0 }
 0x188   :  { %v132_v45 = vadd.f32 %v131_v41, %v60_v40  ;;  %v634_v46 = vpop.f32.mrb[1].mxu0 }
 0x18a   :  { %v135_v48 = vmax.f32 %v132_v45, 0.0 }
 0x18c   :  { %635 = vmatprep.subr.mxu1 %v135_v48 }
 0x18d   :  { %636 = vmatpush3.msra.mxu1 %v135_v48 }
 0x18e   :  { %638 = vmatmul.mubr.msk.f32.vlgmr.msra.gmra.mrb[0].mxu1 %vm144_vm2, %v137_v51  ;;  %668 = vmatprep.subr.bf16.mxu1 %v769_v12 }
 0x18f   :  { %670 = vmatpush3.bf16.msra.mxu1 %v669_v49  ;;  %640 = vmatprep.mubr.msk.f32.mxu1 %vm144_vm2, %v138_v53 }
 0x190   :  { %671 = vmatprep.subr.bf16.mxu1 %v769_v12 }
 0x192   :  { %641 = vmatmul.mubr.msk.f32.gmra.mrb[2].mxu1 %vm144_vm2, %v139_v55 }
 0x193   :  { %673 = vmatpush3.bf16.msra.mxu1 %v672_v54  ;;  %651 = vmatprep.mubr.msk.f32.mxu1 %vm770_vm0, %v771_v13 }
 0x196   :  { %652 = vmatmul.mubr.msk.f32.vlgmr.msra.gmra.mrb[4].mxu1 %vm61_vm1, %v59_v36 }
 0x197   :  { %659 = vmatprep.mubr.msk.f32.mxu1 %vm144_vm2, %v138_v53 }
 0x261   :  { %v639_v59 = vpop.f32.mrb[0].mxu1 }
 0x262   :  { %v229_v60 = vadd.f32 %v639_v59, %v904_v57  ;;  %v223_v61 = vpop.f32.mrb[1].mxu1 }
 0x263   :  { %v224_v62 = vadd.f32 %v223_v61, %v909_v58 }
 0x264   :  { %v592_v3 = vmul.f32 -1.442695, %v229_v60 }
 0x265   :  { %v591_v10 = vmul.f32 -1.442695, %v224_v62  ;;  %v642_v11 = vpop.f32.mrb[2].mxu1 }
 0x266   :  { %686 = vpow2.f32 %v592_v3  ;;  %v239_v12 = vadd.f32 %v642_v11, %v916_v63  ;;  %v233_v13 = vpop.f32.mrb[3].mxu1 }
 0x267   :  { %688 = vpow2.f32 %v591_v10  ;;  %v234_v17 = vadd.f32 %v233_v13, %v921_v7 }
 0x268   :  { %v594_v21 = vmul.f32 -1.442695, %v239_v12 }
 0x269   :  { %v593_v24 = vmul.f32 -1.442695, %v234_v17  ;;  %v398_v25 = vpop.f32.mrb[4].mxu1 }
 0x26a   :  { %690 = vpow2.f32 %v594_v21  ;;  %v399_v26 = vadd.f32 %v398_v25, %v60_v40  ;;  %v653_v27 = vpop.f32.mrb[5].mxu1 }
 0x26b   :  { %692 = vpow2.f32 %v593_v24 }
 0x26c   :  { %v402_v28 = vmax.f32 %v399_v26, 0.0 }
 0x26e   :  { %654 = vmatprep.subr.mxu0 %v402_v28  ;;  %674 = vmatprep.subr.mxu1 %v402_v28 }
 0x26f   :  { %655 = vmatpush3.msra.mxu0 %v402_v28  ;;  %675 = vmatpush3.msra.mxu1 %v402_v28 }
 0x270   :  { %v687_v29 = vpop.eup %686  ;;  %657 = vmatmul.mubr.msk.f32.vlgmr.msra.gmra.mrb[2].mxu0 %vm144_vm2, %v137_v51  ;;  %660 = vmatmul.mubr.msk.f32.vlgmr.msra.gmra.mrb[6].mxu1 %vm144_vm2, %v139_v55 }
 0x271   :  { %v689_v30 = vpop.eup %688  ;;  %v255_v31 = vadd.f32 1.0, %v687_v29 }
 0x272   :  { %v254_v32 = vadd.f32 1.0, %v689_v30 }
 0x273   :  { %694 = vrcp.f32 %v255_v31 }
 0x274   :  { %v691_v33 = vpop.eup %690  ;;  %696 = vrcp.f32 %v254_v32 }
 0x275   :  { %v693_v34 = vpop.eup %692  ;;  %v257_v35 = vadd.f32 1.0, %v691_v33 }
 0x276   :  { %v256_v36 = vadd.f32 1.0, %v693_v34 }
 0x277   :  { %698 = vrcp.f32 %v257_v35 }
 0x278   :  { %700 = vrcp.f32 %v256_v36 }
 0x27d   :  { %v695_v37 = vpop.eup %694 }
 0x27e   :  { %v697_v38 = vpop.eup %696  ;;  %273 = vperm.xlu1 %685, %v695_v37  }
 0x27f   :  { %268 = vperm.xlu0 %684, %v697_v38  }
 0x281   :  { %v699_v39 = vpop.eup %698 }
 0x282   :  { %283 = vperm.xlu1 %685, %v699_v39   ;;  %v701_v40 = vpop.eup %700 }
 0x286   :  { %278 = vperm.xlu1 %685, %v701_v40  }
 0x2fd   :  { %v274_v41 = vpop.permute.xlu1 %273 }
 0x2fe   :  { %v288_v42 = vmul.f32 %v274_v41, %v835_v8  ;;  %v289_v43 = vmul.f32 %v274_v41, %v837_v9  ;;  %v269_v44 = vpop.permute.xlu0 %268 }
 0x2ff   :  { %v286_v45 = vmul.f32 %v269_v44, %v823_v2  ;;  %v287_v46 = vmul.f32 %v269_v44, %v827_v4 }
 0x300   :  { %296 = vst [vmem:[#allocation5 + $0x10] sm:$0xff] %v288_v42  ;;  %297 = vst [vmem:[#allocation5 + $0x18] sm:$0xff] %v289_v43 }
 0x301   :  { %294 = vst [vmem:[#allocation5] sm:$0xff] %v286_v45  ;;  %295 = vst [vmem:[#allocation5 + $0x8] sm:$0xff] %v287_v46  ;;  %v284_v47 = vpop.permute.xlu1 %283 }
 0x302   :  { %v292_v48 = vmul.f32 %v284_v47, %v829_v5  ;;  %v293_v49 = vmul.f32 %v284_v47, %v831_v6 }
 0x304   :  { %300 = vst [vmem:[#allocation5 + $0x30] sm:$0xff] %v292_v48  ;;  %301 = vst [vmem:[#allocation5 + $0x38] sm:$0xff] %v293_v49 }
 0x305   :  { %v279_v50 = vpop.permute.xlu1 %278 }
 0x306   :  { %v290_v8 = vmul.f32 %v279_v50, %v819_v0  ;;  %v291_v9 = vmul.f32 %v279_v50, %v821_v1 }
 0x308   :  { %298 = vst [vmem:[#allocation5 + $0x20] sm:$0xff] %v290_v8  ;;  %299 = vst [vmem:[#allocation5 + $0x28] sm:$0xff] %v291_v9 }
 0x343   :  { %v658_v2 = vpop.f32.mrb[2].mxu0  ;;  %v661_v4 = vpop.f32.mrb[6].mxu1 }
 0x344   :  { %v495_v51 = vadd.f32 %v658_v2, %v904_v57  ;;  %v489_v52 = vpop.f32.mrb[3].mxu0  ;;  %v499_v53 = vpop.f32.mrb[7].mxu1  ;;  %v505_v0 = vadd.f32 %v661_v4, %v916_v63 }
 0x345   :  { %v490_v54 = vadd.f32 %v489_v52, %v909_v58  ;;  %v500_v5 = vadd.f32 %v499_v53, %v921_v7 }
 0x346   :  { %v601_v6 = vmul.f32 -1.442695, %v495_v51  ;;  %v603_v1 = vmul.f32 -1.442695, %v505_v0 }
 0x347   :  { %v600_v55 = vmul.f32 -1.442695, %v490_v54  ;;  %v602_v56 = vmul.f32 -1.442695, %v500_v5 }
 0x348   :  { %702 = vpow2.f32 %v601_v6 }
 0x349   :  { %704 = vpow2.f32 %v600_v55 }
 0x34a   :  { %706 = vpow2.f32 %v602_v56 }
 0x34b   :  { %708 = vpow2.f32 %v603_v1 }
 0x352   :  { %v703_v59 = vpop.eup %702 }
 0x353   :  { %v705_v60 = vpop.eup %704  ;;  %v521_v61 = vadd.f32 1.0, %v703_v59 }
 0x354   :  { %v707_v57 = vpop.eup %706  ;;  %v520_v62 = vadd.f32 1.0, %v705_v60 }
 0x355   :  { %710 = vrcp.f32 %v521_v61  ;;  %v522_v3 = vadd.f32 1.0, %v707_v57  ;;  %v709_v58 = vpop.eup %708 }
 0x356   :  { %712 = vrcp.f32 %v520_v62  ;;  %v523_v7 = vadd.f32 1.0, %v709_v58 }
 0x357   :  { %714 = vrcp.f32 %v522_v3 }
 0x358   :  { %716 = vrcp.f32 %v523_v7 }
 0x35f   :  { %v711_v10 = vpop.eup %710 }
 0x360   :  { %539 = vperm.xlu1 %685, %v711_v10   ;;  %v713_v11 = vpop.eup %712 }
 0x361   :  { %v715_v63 = vpop.eup %714 }
 0x362   :  { %v717_v12 = vpop.eup %716 }
 0x364   :  { %534 = vperm.xlu1 %685, %v713_v11  }
 0x368   :  { %544 = vperm.xlu1 %685, %v715_v63  }
 0x36c   :  { %549 = vperm.xlu1 %685, %v717_v12  }
 0x3df   :  { %v540_v13 = vpop.permute.xlu1 %539 }
 0x3e0   :  { %v554_v17 = vmul.f32 %v540_v13, %v846_v14  ;;  %v555_v21 = vmul.f32 %v540_v13, %v848_v15 }
 0x3e2   :  { %563 = vst [vmem:[#allocation5 + $0x50] sm:$0xff] %v554_v17  ;;  %564 = vst [vmem:[#allocation5 + $0x58] sm:$0xff] %v555_v21 }
 0x3e3   :  { %v535_v24 = vpop.permute.xlu1 %534 }
 0x3e4   :  { %v552_v25 = vmul.f32 %v535_v24, %v850_v16  ;;  %v553_v26 = vmul.f32 %v535_v24, %v854_v18 }
 0x3e6   :  { %561 = vst [vmem:[#allocation5 + $0x40] sm:$0xff] %v552_v25  ;;  %562 = vst [vmem:[#allocation5 + $0x48] sm:$0xff] %v553_v26 }
 0x3e7   :  { %v545_v27 = vpop.permute.xlu1 %544 }
 0x3e8   :  { %v556_v28 = vmul.f32 %v545_v27, %v862_v22  ;;  %v557_v29 = vmul.f32 %v545_v27, %v864_v23 }
 0x3ea   :  { %565 = vst [vmem:[#allocation5 + $0x60] sm:$0xff] %v556_v28  ;;  %566 = vst [vmem:[#allocation5 + $0x68] sm:$0xff] %v557_v29 }
 0x3eb   :  { %v550_v14 = vpop.permute.xlu1 %549 }
 0x3ec   :  { %v558_v15 = vmul.f32 %v550_v14, %v856_v19  ;;  %v559_v30 = vmul.f32 %v550_v14, %v858_v20 }
 0x3ee   :  { %567 = vst [vmem:[#allocation5 + $0x70] sm:$0xff] %v558_v15  ;;  %568 = vst [vmem:[#allocation5 + $0x78] sm:$0xff] %v559_v30 }
 0x3ef   :  { %751 = shalt.err (!%p748_p12)
}
 0x3f0   :  { %s752_s27 = scalar_lea.hbm %s967_s5, 2048 }
 0x3f1   :  { %p753_p13 = scmp.ne.s32.totalorder %s967_s5, %s752_s27  ;;  %p756_p0 = scmp.lt.u32.totalorder %s752_s27, %s967_s5 }
 0x3f3   :  { %p758_p1 = pnand %p756_p0, %p753_p13 }
 0x3f5   :  { %761 = shalt.err (!%p758_p1)
}
 0x3f6   :  { %580 = dma.vmem_to_hbm [thread:$0]  %s575_s23, 2048, %s967_s5, [#allocation4], %s767_s28, %s767_s28, %s768_s29  }
 0x3f7   :  { %764 = dma.done.wait [#allocation4], 2048  }
 0x3f8   :  { %765 = vsyncadd [#allocation4], 4294965248 }
 0x3f9   :  { %584 = vsyncpa [#allocation3], 1 }
 0x3fa   :  { %585 = vsyncpa [#allocation4], 1 }

</bundles_post_ra>
